<compile_context>
chip_gen: v7x
topology: tpu7x:2x2x1
jax: 0.10.0
libtpu: 0.0.40
codegen_flags: <defaults>
</compile_context>

<pallas_src>
from functools import partial

import jax
import jax.numpy as jnp
from jax.experimental import pallas as pl
from jax.experimental import pallas as _pl_unused  # keep namespace tidy
from jax.experimental.pallas import tpu as pltpu  # noqa: F401  (not needed gridless)

EPS = 1e-5  # torch.nn.LayerNorm default eps


def _layernorm(x, g, b):
    """Single-pass LayerNorm: var = E[x^2] - mu^2."""
    mu = jnp.mean(x, axis=-1, keepdims=True)
    var = jnp.mean(x * x, axis=-1, keepdims=True) - mu * mu
    return (x - mu) * jax.lax.rsqrt(var + EPS) * g + b


# ------------------------------ Pallas kernel ------------------------------

def transformer_layer_kernel(x_ref, wqkv_ref, bqkv_ref, wslab_ref, pslab_ref,
                             o_ref, *, batch, seq, heads):
    """Whole TransformerLayer forward, fully fused, single invocation.

    x_ref    : (B*L, C) tokens, batch-major (row = b*L + l)
    wqkv_ref : (C, 3C)  fused q/k/v projection weights (1/sqrt(hd) folded into q)
    bqkv_ref : (1, 3C)  fused q/k/v biases (scale folded into q part)
    wslab_ref: (2C, C)  rows [0:C)  = out_proj weight (transposed),
                        rows [C:2C) = fc2(fc1(.)) pre-folded weight
    pslab_ref: (5, C)   rows = [out_b, norm1_g, norm1_b, norm2_g, norm2_b]
    """
    x = x_ref[...]                                   # (B*L, C) f32
    BL, C = x.shape
    hd = C // heads

    ob = pslab_ref[0:1]                              # (1, C)
    n1g, n1b = pslab_ref[1:2], pslab_ref[2:3]
    n2g, n2b = pslab_ref[3:4], pslab_ref[4:5]
    ws = wslab_ref[...]                              # (2C, C)

    # ---- fused QKV projection: ONE MXU push with 3C output lanes ------------
    qkv = jnp.dot(x, wqkv_ref[...],
                  preferred_element_type=jnp.float32) + bqkv_ref[...]   # (B*L, 3C)

    # ---- block-diagonal (per-batch) mask: iota + scalar compares only -------
    ri = jax.lax.broadcasted_iota(jnp.int32, (BL, BL), 0)
    ci = jax.lax.broadcasted_iota(jnp.int32, (BL, BL), 1)
    same_batch = None
    for b in range(batch):                            # static, B iterations
        lo, hi = b * seq, (b + 1) * seq
        blk = (ri >= lo) & (ri < hi) & (ci >= lo) & (ci < hi)
        same_batch = blk if same_batch is None else (same_batch | blk)

    # ---- per-head attention (normalization deferred to after PV) ------------
    oh_list = []
    for h in range(heads):                            # static lane slices of qkv
        qh = qkv[:, h * hd:(h + 1) * hd]
        kh = qkv[:, C + h * hd: C + (h + 1) * hd]
        vh = qkv[:, 2 * C + h * hd: 2 * C + (h + 1) * hd]
        s = jax.lax.dot_general(qh, kh, (((1,), (1,)), ((), ())),
                                preferred_element_type=jnp.float32)     # (B*L, B*L)
        s = jnp.where(same_batch, s, -1e30)
        e = jnp.exp(s - jnp.max(s, axis=-1, keepdims=True))
        denom = jnp.sum(e, axis=-1, keepdims=True)                      # (B*L, 1)
        oh = jnp.dot(e, vh, preferred_element_type=jnp.float32)         # (B*L, hd)
        oh_list.append(oh * pl.reciprocal(denom, approx=True))

    # ---- head-concat + out_proj: H back-to-back accumulating dots -----------
    acc = jnp.dot(oh_list[0], ws[0:hd], preferred_element_type=jnp.float32)
    for h in range(1, heads):
        acc = acc + jnp.dot(oh_list[h], ws[h * hd:(h + 1) * hd],
                            preferred_element_type=jnp.float32)
    attn = acc + ob                                   # (B*L, C)

    # ---- residual + norm1 ----------------------------------------------------
    x1 = x + attn
    y1 = _layernorm(x1, n1g, n1b)

    # ---- MLP (fc2∘fc1 pre-folded) + residual + norm2 -------------------------
    x2 = y1 + jnp.dot(y1, ws[C:], preferred_element_type=jnp.float32)
    o_ref[...] = _layernorm(x2, n2g, n2b)


# ------------------------------ one-time weight folding ------------------------------

def fold_params(P, num_heads):
    """Runs ONCE (per weight update), outside the per-token forward."""
    C = P["wq"].shape[0]
    hd = C // num_heads
    scale = hd ** -0.5

    Wi, bi = P["in_proj_w"], P["in_proj_b"]
    # q = (x @ Wq.T) @ Wq_in.T + bq  ==  x @ (Wq_in @ Wq).T + bq ; fold 1/sqrt(hd) into q.
    Aq = (Wi[:C] @ P["wq"]).T * scale
    Ak = (Wi[C:2 * C] @ P["wk"]).T
    Av = (Wi[2 * C:] @ P["wv"]).T
    wqkv = jnp.concatenate([Aq, Ak, Av], axis=1)                         # (C, 3C)
    bqkv = jnp.concatenate([bi[:C] * scale, bi[C:2 * C], bi[2 * C:]]).reshape(1, 3 * C)

    fcw = P["fc1_w"].T @ P["fc2_w"].T                                    # fc2(fc1(.)) fold
    wslab = jnp.concatenate([P["out_w"].T, fcw], axis=0)                 # (2C, C)
    pslab = jnp.stack([P["out_b"], P["n1_g"], P["n1_b"],
                       P["n2_g"], P["n2_b"]], axis=0)                    # (5, C)
    return wqkv, bqkv, wslab, pslab


# ------------------------------ forward wrapper ------------------------------

@partial(jax.jit, static_argnames=("num_heads",))
def transformer_layer_forward(x, wqkv, bqkv, wslab, pslab, num_heads):
    """x: (L, B, C), same layout the PyTorch module expects (torch MHA default)."""
    L, B, C = x.shape
    # (L, B, C) -> (B*L, C): batches become contiguous sublane blocks.
    xt = jnp.transpose(x, (1, 0, 2)).reshape(B * L, C)

    out = pl.pallas_call(
        partial(transformer_layer_kernel, batch=B, seq=L, heads=num_heads),
        out_shape=jax.ShapeDtypeStruct((B * L, C), jnp.float32),
    )(xt, wqkv, bqkv, wslab, pslab)

    return out.reshape(B, L, C).transpose(1, 0, 2)    # back to (L, B, C)


# ------------------------------ params & reference ------------------------------

def init_params(key, c, num_heads):
    keys = list(jax.random.split(key, 16))
    it = iter(keys)

    def r(shape, s=0.1):
        return (s * jax.random.normal(next(it), shape)).astype(jnp.float32)

    return {
        "wq": r((c, c)), "wk": r((c, c)), "wv": r((c, c)),
        "in_proj_w": r((3 * c, c)), "in_proj_b": r((3 * c,), 0.02),
        "out_w": r((c, c)), "out_b": r((c,), 0.02),
        "fc1_w": r((c, c)), "fc2_w": r((c, c)),
        "n1_g": jnp.ones((c,), jnp.float32) + r((c,), 0.01),
        "n1_b": r((c,), 0.01),
        "n2_g": jnp.ones((c,), jnp.float32) + r((c,), 0.01),
        "n2_b": r((c,), 0.01),
    }


def _ln_ref(x, g, b):
    mu = jnp.mean(x, axis=-1, keepdims=True)
    var = jnp.mean((x - mu) ** 2, axis=-1, keepdims=True)
    return (x - mu) * jax.lax.rsqrt(var + EPS) * g + b


def ref_forward(x, P, num_heads):
    """Pure-JAX faithful re-implementation of the PyTorch forward (checking only)."""
    L, B, C = x.shape
    hd = C // num_heads
    scale = hd ** -0.5
    q0 = x @ P["wq"].T
    k0 = x @ P["wk"].T
    v0 = x @ P["wv"].T
    Wi, bi = P["in_proj_w"], P["in_proj_b"]
    q = q0 @ Wi[:C].T + bi[:C]
    k = k0 @ Wi[C:2 * C].T + bi[C:2 * C]
    v = v0 @ Wi[2 * C:].T + bi[2 * C:]

    def heads(t):  # (L, B, C) -> (B*H, L, hd), same ordering as torch MHA
        return t.reshape(L, B * num_heads, hd).transpose(1, 0, 2)

    qh, kh, vh = heads(q) * scale, heads(k), heads(v)
    a = jax.nn.softmax(qh @ jnp.swapaxes(kh, -1, -2), axis=-1)
    o = (a @ vh).transpose(1, 0, 2).reshape(L, B, C)
    attn = o @ P["out_w"].T + P["out_b"]

    x1 = attn + x
    y1 = _ln_ref(x1, P["n1_g"], P["n1_b"])
    x2 = (y1 @ P["fc1_w"].T) @ P["fc2_w"].T + y1
    return _ln_ref(x2, P["n2_g"], P["n2_b"])


if __name__ == "__main__":
    L, B, C, H = 8, 2, 32, 4            # seq=8, batch=2, c=32, num_heads=4

    key = jax.random.PRNGKey(0)
    kx, kp = jax.random.split(key)
    x = jax.random.normal(kx, (L, B, C), dtype=jnp.float32)
    P = init_params(kp, C, H)

    # One-time weight folding/packing (NOT part of the per-call forward).
    packed = fold_params(P, H)
    packed = tuple(jax.block_until_ready(p) for p in packed)

    out = transformer_layer_forward(x, *packed, num_heads=H)
    out = jax.block_until_ready(out)

    ref = ref_forward(x, P, H)
    assert out.shape == (L, B, C)
    assert bool(jnp.allclose(out, ref, atol=3e-3, rtol=3e-3)), "mismatch vs JAX reference"
    print("KERNEL_OK")
</pallas_src>

<mosaic_0001>
module attributes {stable_mosaic.version = 11 : i64} {
  func.func @transformer_layer_kernel(%arg0: memref<16x32xf32, #tpu.memory_space<vmem>>, %arg1: memref<32x96xf32, #tpu.memory_space<vmem>>, %arg2: memref<1x96xf32, #tpu.memory_space<vmem>>, %arg3: memref<64x32xf32, #tpu.memory_space<vmem>>, %arg4: memref<5x32xf32, #tpu.memory_space<vmem>>, %arg5: memref<16x32xf32, #tpu.memory_space<vmem>>) attributes {dimension_semantics = [], scalar_prefetch = 0 : i64, scratch_operands = 0 : i64, tpu.core_type = #tpu.core_type<tc>} {
    %c0 = arith.constant 0 : index
    %c0_0 = arith.constant 0 : index
    %0 = vector.load %arg0[%c0, %c0_0] : memref<16x32xf32, #tpu.memory_space<vmem>>, vector<16x32xf32>
    %c0_1 = arith.constant 0 : index
    %c0_2 = arith.constant 0 : index
    %1 = vector.load %arg4[%c0_1, %c0_2] : memref<5x32xf32, #tpu.memory_space<vmem>>, vector<1x32xf32>
    %c1 = arith.constant 1 : index
    %c0_3 = arith.constant 0 : index
    %2 = vector.load %arg4[%c1, %c0_3] : memref<5x32xf32, #tpu.memory_space<vmem>>, vector<1x32xf32>
    %c2 = arith.constant 2 : index
    %c0_4 = arith.constant 0 : index
    %3 = vector.load %arg4[%c2, %c0_4] : memref<5x32xf32, #tpu.memory_space<vmem>>, vector<1x32xf32>
    %c3 = arith.constant 3 : index
    %c0_5 = arith.constant 0 : index
    %4 = vector.load %arg4[%c3, %c0_5] : memref<5x32xf32, #tpu.memory_space<vmem>>, vector<1x32xf32>
    %c4 = arith.constant 4 : index
    %c0_6 = arith.constant 0 : index
    %5 = vector.load %arg4[%c4, %c0_6] : memref<5x32xf32, #tpu.memory_space<vmem>>, vector<1x32xf32>
    %c0_7 = arith.constant 0 : index
    %c0_8 = arith.constant 0 : index
    %6 = vector.load %arg3[%c0_7, %c0_8] : memref<64x32xf32, #tpu.memory_space<vmem>>, vector<64x32xf32>
    %c0_9 = arith.constant 0 : index
    %c0_10 = arith.constant 0 : index
    %7 = vector.load %arg1[%c0_9, %c0_10] : memref<32x96xf32, #tpu.memory_space<vmem>>, vector<32x96xf32>
    %cst = arith.constant dense<0.000000e+00> : vector<16x96xf32>
    %8 = tpu.matmul %0, %7, %cst {dimension_numbers = #tpu.dot_dimension_numbers<[1], [0], [0], [1], [0, 0, 1, 1], [], []>} : vector<16x32xf32>, vector<32x96xf32>, vector<16x96xf32> -> vector<16x96xf32>
    %c0_11 = arith.constant 0 : index
    %c0_12 = arith.constant 0 : index
    %9 = vector.load %arg2[%c0_11, %c0_12] : memref<1x96xf32, #tpu.memory_space<vmem>>, vector<1x96xf32>
    %10 = vector.broadcast %9 : vector<1x96xf32> to vector<16x96xf32>
    %11 = arith.addf %8, %10 : vector<16x96xf32>
    %12 = tpu.iota {dimensions = array<i32: 0>} : vector<16x16xi32>
    %13 = tpu.iota {dimensions = array<i32: 1>} : vector<16x16xi32>
    %c0_i32 = arith.constant 0 : i32
    %14 = vector.broadcast %c0_i32 : i32 to vector<16x16xi32>
    %15 = arith.cmpi sge, %12, %14 : vector<16x16xi32>
    %c8_i32 = arith.constant 8 : i32
    %16 = vector.broadcast %c8_i32 : i32 to vector<16x16xi32>
    %17 = arith.cmpi slt, %12, %16 : vector<16x16xi32>
    %18 = arith.andi %15, %17 : vector<16x16xi1>
    %c0_i32_13 = arith.constant 0 : i32
    %19 = vector.broadcast %c0_i32_13 : i32 to vector<16x16xi32>
    %20 = arith.cmpi sge, %13, %19 : vector<16x16xi32>
    %21 = arith.andi %18, %20 : vector<16x16xi1>
    %c8_i32_14 = arith.constant 8 : i32
    %22 = vector.broadcast %c8_i32_14 : i32 to vector<16x16xi32>
    %23 = arith.cmpi slt, %13, %22 : vector<16x16xi32>
    %24 = arith.andi %21, %23 : vector<16x16xi1>
    %c8_i32_15 = arith.constant 8 : i32
    %25 = vector.broadcast %c8_i32_15 : i32 to vector<16x16xi32>
    %26 = arith.cmpi sge, %12, %25 : vector<16x16xi32>
    %c16_i32 = arith.constant 16 : i32
    %27 = vector.broadcast %c16_i32 : i32 to vector<16x16xi32>
    %28 = arith.cmpi slt, %12, %27 : vector<16x16xi32>
    %29 = arith.andi %26, %28 : vector<16x16xi1>
    %c8_i32_16 = arith.constant 8 : i32
    %30 = vector.broadcast %c8_i32_16 : i32 to vector<16x16xi32>
    %31 = arith.cmpi sge, %13, %30 : vector<16x16xi32>
    %32 = arith.andi %29, %31 : vector<16x16xi1>
    %c16_i32_17 = arith.constant 16 : i32
    %33 = vector.broadcast %c16_i32_17 : i32 to vector<16x16xi32>
    %34 = arith.cmpi slt, %13, %33 : vector<16x16xi32>
    %35 = arith.andi %32, %34 : vector<16x16xi1>
    %36 = arith.ori %24, %35 : vector<16x16xi1>
    %37 = vector.extract_strided_slice %11 {offsets = [0, 0], sizes = [16, 8], strides = [1, 1]} : vector<16x96xf32> to vector<16x8xf32>
    %38 = vector.extract_strided_slice %11 {offsets = [0, 32], sizes = [16, 8], strides = [1, 1]} : vector<16x96xf32> to vector<16x8xf32>
    %39 = vector.extract_strided_slice %11 {offsets = [0, 64], sizes = [16, 8], strides = [1, 1]} : vector<16x96xf32> to vector<16x8xf32>
    %cst_18 = arith.constant dense<0.000000e+00> : vector<16x16xf32>
    %40 = tpu.matmul %37, %38, %cst_18 {dimension_numbers = #tpu.dot_dimension_numbers<[1], [1], [0], [0], [0, 0, 1, 0], [], []>} : vector<16x8xf32>, vector<16x8xf32>, vector<16x16xf32> -> vector<16x16xf32>
    %cst_19 = arith.constant -1.000000e+30 : f32
    %41 = vector.broadcast %cst_19 : f32 to vector<16x16xf32>
    %42 = arith.select %36, %40, %41 : vector<16x16xi1>, vector<16x16xf32>
    %cst_20 = arith.constant dense<0xFF800000> : vector<16xf32>
    %43 = vector.multi_reduction <maximumf>, %42, %cst_20 [1] : vector<16x16xf32> to vector<16xf32>
    %44 = vector.shape_cast %43 : vector<16xf32> to vector<16x1xf32>
    %45 = vector.broadcast %44 : vector<16x1xf32> to vector<16x16xf32>
    %46 = arith.subf %42, %45 : vector<16x16xf32>
    %47 = math.exp %46 : vector<16x16xf32>
    %cst_21 = arith.constant dense<0.000000e+00> : vector<16xf32>
    %48 = vector.multi_reduction <add>, %47, %cst_21 [1] : vector<16x16xf32> to vector<16xf32>
    %49 = vector.shape_cast %48 : vector<16xf32> to vector<16x1xf32>
    %cst_22 = arith.constant dense<0.000000e+00> : vector<16x8xf32>
    %50 = tpu.matmul %47, %39, %cst_22 {dimension_numbers = #tpu.dot_dimension_numbers<[1], [0], [0], [1], [0, 0, 1, 1], [], []>} : vector<16x16xf32>, vector<16x8xf32>, vector<16x8xf32> -> vector<16x8xf32>
    %51 = tpu.reciprocal %49 {approx = true} : vector<16x1xf32> -> vector<16x1xf32>
    %52 = vector.broadcast %51 : vector<16x1xf32> to vector<16x8xf32>
    %53 = arith.mulf %50, %52 : vector<16x8xf32>
    %54 = vector.extract_strided_slice %11 {offsets = [0, 8], sizes = [16, 8], strides = [1, 1]} : vector<16x96xf32> to vector<16x8xf32>
    %55 = vector.extract_strided_slice %11 {offsets = [0, 40], sizes = [16, 8], strides = [1, 1]} : vector<16x96xf32> to vector<16x8xf32>
    %56 = vector.extract_strided_slice %11 {offsets = [0, 72], sizes = [16, 8], strides = [1, 1]} : vector<16x96xf32> to vector<16x8xf32>
    %cst_23 = arith.constant dense<0.000000e+00> : vector<16x16xf32>
    %57 = tpu.matmul %54, %55, %cst_23 {dimension_numbers = #tpu.dot_dimension_numbers<[1], [1], [0], [0], [0, 0, 1, 0], [], []>} : vector<16x8xf32>, vector<16x8xf32>, vector<16x16xf32> -> vector<16x16xf32>
    %cst_24 = arith.constant -1.000000e+30 : f32
    %58 = vector.broadcast %cst_24 : f32 to vector<16x16xf32>
    %59 = arith.select %36, %57, %58 : vector<16x16xi1>, vector<16x16xf32>
    %cst_25 = arith.constant dense<0xFF800000> : vector<16xf32>
    %60 = vector.multi_reduction <maximumf>, %59, %cst_25 [1] : vector<16x16xf32> to vector<16xf32>
    %61 = vector.shape_cast %60 : vector<16xf32> to vector<16x1xf32>
    %62 = vector.broadcast %61 : vector<16x1xf32> to vector<16x16xf32>
    %63 = arith.subf %59, %62 : vector<16x16xf32>
    %64 = math.exp %63 : vector<16x16xf32>
    %cst_26 = arith.constant dense<0.000000e+00> : vector<16xf32>
    %65 = vector.multi_reduction <add>, %64, %cst_26 [1] : vector<16x16xf32> to vector<16xf32>
    %66 = vector.shape_cast %65 : vector<16xf32> to vector<16x1xf32>
    %cst_27 = arith.constant dense<0.000000e+00> : vector<16x8xf32>
    %67 = tpu.matmul %64, %56, %cst_27 {dimension_numbers = #tpu.dot_dimension_numbers<[1], [0], [0], [1], [0, 0, 1, 1], [], []>} : vector<16x16xf32>, vector<16x8xf32>, vector<16x8xf32> -> vector<16x8xf32>
    %68 = tpu.reciprocal %66 {approx = true} : vector<16x1xf32> -> vector<16x1xf32>
    %69 = vector.broadcast %68 : vector<16x1xf32> to vector<16x8xf32>
    %70 = arith.mulf %67, %69 : vector<16x8xf32>
    %71 = vector.extract_strided_slice %11 {offsets = [0, 16], sizes = [16, 8], strides = [1, 1]} : vector<16x96xf32> to vector<16x8xf32>
    %72 = vector.extract_strided_slice %11 {offsets = [0, 48], sizes = [16, 8], strides = [1, 1]} : vector<16x96xf32> to vector<16x8xf32>
    %73 = vector.extract_strided_slice %11 {offsets = [0, 80], sizes = [16, 8], strides = [1, 1]} : vector<16x96xf32> to vector<16x8xf32>
    %cst_28 = arith.constant dense<0.000000e+00> : vector<16x16xf32>
    %74 = tpu.matmul %71, %72, %cst_28 {dimension_numbers = #tpu.dot_dimension_numbers<[1], [1], [0], [0], [0, 0, 1, 0], [], []>} : vector<16x8xf32>, vector<16x8xf32>, vector<16x16xf32> -> vector<16x16xf32>
    %cst_29 = arith.constant -1.000000e+30 : f32
    %75 = vector.broadcast %cst_29 : f32 to vector<16x16xf32>
    %76 = arith.select %36, %74, %75 : vector<16x16xi1>, vector<16x16xf32>
    %cst_30 = arith.constant dense<0xFF800000> : vector<16xf32>
    %77 = vector.multi_reduction <maximumf>, %76, %cst_30 [1] : vector<16x16xf32> to vector<16xf32>
    %78 = vector.shape_cast %77 : vector<16xf32> to vector<16x1xf32>
    %79 = vector.broadcast %78 : vector<16x1xf32> to vector<16x16xf32>
    %80 = arith.subf %76, %79 : vector<16x16xf32>
    %81 = math.exp %80 : vector<16x16xf32>
    %cst_31 = arith.constant dense<0.000000e+00> : vector<16xf32>
    %82 = vector.multi_reduction <add>, %81, %cst_31 [1] : vector<16x16xf32> to vector<16xf32>
    %83 = vector.shape_cast %82 : vector<16xf32> to vector<16x1xf32>
    %cst_32 = arith.constant dense<0.000000e+00> : vector<16x8xf32>
    %84 = tpu.matmul %81, %73, %cst_32 {dimension_numbers = #tpu.dot_dimension_numbers<[1], [0], [0], [1], [0, 0, 1, 1], [], []>} : vector<16x16xf32>, vector<16x8xf32>, vector<16x8xf32> -> vector<16x8xf32>
    %85 = tpu.reciprocal %83 {approx = true} : vector<16x1xf32> -> vector<16x1xf32>
    %86 = vector.broadcast %85 : vector<16x1xf32> to vector<16x8xf32>
    %87 = arith.mulf %84, %86 : vector<16x8xf32>
    %88 = vector.extract_strided_slice %11 {offsets = [0, 24], sizes = [16, 8], strides = [1, 1]} : vector<16x96xf32> to vector<16x8xf32>
    %89 = vector.extract_strided_slice %11 {offsets = [0, 56], sizes = [16, 8], strides = [1, 1]} : vector<16x96xf32> to vector<16x8xf32>
    %90 = vector.extract_strided_slice %11 {offsets = [0, 88], sizes = [16, 8], strides = [1, 1]} : vector<16x96xf32> to vector<16x8xf32>
    %cst_33 = arith.constant dense<0.000000e+00> : vector<16x16xf32>
    %91 = tpu.matmul %88, %89, %cst_33 {dimension_numbers = #tpu.dot_dimension_numbers<[1], [1], [0], [0], [0, 0, 1, 0], [], []>} : vector<16x8xf32>, vector<16x8xf32>, vector<16x16xf32> -> vector<16x16xf32>
    %cst_34 = arith.constant -1.000000e+30 : f32
    %92 = vector.broadcast %cst_34 : f32 to vector<16x16xf32>
    %93 = arith.select %36, %91, %92 : vector<16x16xi1>, vector<16x16xf32>
    %cst_35 = arith.constant dense<0xFF800000> : vector<16xf32>
    %94 = vector.multi_reduction <maximumf>, %93, %cst_35 [1] : vector<16x16xf32> to vector<16xf32>
    %95 = vector.shape_cast %94 : vector<16xf32> to vector<16x1xf32>
    %96 = vector.broadcast %95 : vector<16x1xf32> to vector<16x16xf32>
    %97 = arith.subf %93, %96 : vector<16x16xf32>
    %98 = math.exp %97 : vector<16x16xf32>
    %cst_36 = arith.constant dense<0.000000e+00> : vector<16xf32>
    %99 = vector.multi_reduction <add>, %98, %cst_36 [1] : vector<16x16xf32> to vector<16xf32>
    %100 = vector.shape_cast %99 : vector<16xf32> to vector<16x1xf32>
    %cst_37 = arith.constant dense<0.000000e+00> : vector<16x8xf32>
    %101 = tpu.matmul %98, %90, %cst_37 {dimension_numbers = #tpu.dot_dimension_numbers<[1], [0], [0], [1], [0, 0, 1, 1], [], []>} : vector<16x16xf32>, vector<16x8xf32>, vector<16x8xf32> -> vector<16x8xf32>
    %102 = tpu.reciprocal %100 {approx = true} : vector<16x1xf32> -> vector<16x1xf32>
    %103 = vector.broadcast %102 : vector<16x1xf32> to vector<16x8xf32>
    %104 = arith.mulf %101, %103 : vector<16x8xf32>
    %105 = vector.extract_strided_slice %6 {offsets = [0, 0], sizes = [8, 32], strides = [1, 1]} : vector<64x32xf32> to vector<8x32xf32>
    %cst_38 = arith.constant dense<0.000000e+00> : vector<16x32xf32>
    %106 = tpu.matmul %53, %105, %cst_38 {dimension_numbers = #tpu.dot_dimension_numbers<[1], [0], [0], [1], [0, 0, 1, 1], [], []>} : vector<16x8xf32>, vector<8x32xf32>, vector<16x32xf32> -> vector<16x32xf32>
    %107 = vector.extract_strided_slice %6 {offsets = [8, 0], sizes = [8, 32], strides = [1, 1]} : vector<64x32xf32> to vector<8x32xf32>
    %cst_39 = arith.constant dense<0.000000e+00> : vector<16x32xf32>
    %108 = tpu.matmul %70, %107, %cst_39 {dimension_numbers = #tpu.dot_dimension_numbers<[1], [0], [0], [1], [0, 0, 1, 1], [], []>} : vector<16x8xf32>, vector<8x32xf32>, vector<16x32xf32> -> vector<16x32xf32>
    %109 = arith.addf %106, %108 : vector<16x32xf32>
    %110 = vector.extract_strided_slice %6 {offsets = [16, 0], sizes = [8, 32], strides = [1, 1]} : vector<64x32xf32> to vector<8x32xf32>
    %cst_40 = arith.constant dense<0.000000e+00> : vector<16x32xf32>
    %111 = tpu.matmul %87, %110, %cst_40 {dimension_numbers = #tpu.dot_dimension_numbers<[1], [0], [0], [1], [0, 0, 1, 1], [], []>} : vector<16x8xf32>, vector<8x32xf32>, vector<16x32xf32> -> vector<16x32xf32>
    %112 = arith.addf %109, %111 : vector<16x32xf32>
    %113 = vector.extract_strided_slice %6 {offsets = [24, 0], sizes = [8, 32], strides = [1, 1]} : vector<64x32xf32> to vector<8x32xf32>
    %cst_41 = arith.constant dense<0.000000e+00> : vector<16x32xf32>
    %114 = tpu.matmul %104, %113, %cst_41 {dimension_numbers = #tpu.dot_dimension_numbers<[1], [0], [0], [1], [0, 0, 1, 1], [], []>} : vector<16x8xf32>, vector<8x32xf32>, vector<16x32xf32> -> vector<16x32xf32>
    %115 = arith.addf %112, %114 : vector<16x32xf32>
    %116 = vector.broadcast %1 : vector<1x32xf32> to vector<16x32xf32>
    %117 = arith.addf %115, %116 : vector<16x32xf32>
    %118 = arith.addf %0, %117 : vector<16x32xf32>
    %cst_42 = arith.constant dense<0.000000e+00> : vector<16xf32>
    %119 = vector.multi_reduction <add>, %118, %cst_42 [1] : vector<16x32xf32> to vector<16xf32>
    %120 = vector.shape_cast %119 : vector<16xf32> to vector<16x1xf32>
    %cst_43 = arith.constant 3.200000e+01 : f32
    %121 = vector.broadcast %cst_43 : f32 to vector<16x1xf32>
    %122 = arith.divf %120, %121 : vector<16x1xf32>
    %123 = arith.mulf %118, %118 : vector<16x32xf32>
    %cst_44 = arith.constant dense<0.000000e+00> : vector<16xf32>
    %124 = vector.multi_reduction <add>, %123, %cst_44 [1] : vector<16x32xf32> to vector<16xf32>
    %125 = vector.shape_cast %124 : vector<16xf32> to vector<16x1xf32>
    %cst_45 = arith.constant 3.200000e+01 : f32
    %126 = vector.broadcast %cst_45 : f32 to vector<16x1xf32>
    %127 = arith.divf %125, %126 : vector<16x1xf32>
    %128 = arith.mulf %122, %122 : vector<16x1xf32>
    %129 = arith.subf %127, %128 : vector<16x1xf32>
    %130 = vector.broadcast %122 : vector<16x1xf32> to vector<16x32xf32>
    %131 = arith.subf %118, %130 : vector<16x32xf32>
    %cst_46 = arith.constant 9.99999974E-6 : f32
    %132 = vector.broadcast %cst_46 : f32 to vector<16x1xf32>
    %133 = arith.addf %129, %132 : vector<16x1xf32>
    %134 = math.rsqrt %133 : vector<16x1xf32>
    %135 = vector.broadcast %134 : vector<16x1xf32> to vector<16x32xf32>
    %136 = arith.mulf %131, %135 : vector<16x32xf32>
    %137 = vector.broadcast %2 : vector<1x32xf32> to vector<16x32xf32>
    %138 = arith.mulf %136, %137 : vector<16x32xf32>
    %139 = vector.broadcast %3 : vector<1x32xf32> to vector<16x32xf32>
    %140 = arith.addf %138, %139 : vector<16x32xf32>
    %141 = vector.extract_strided_slice %6 {offsets = [32, 0], sizes = [32, 32], strides = [1, 1]} : vector<64x32xf32> to vector<32x32xf32>
    %cst_47 = arith.constant dense<0.000000e+00> : vector<16x32xf32>
    %142 = tpu.matmul %140, %141, %cst_47 {dimension_numbers = #tpu.dot_dimension_numbers<[1], [0], [0], [1], [0, 0, 1, 1], [], []>} : vector<16x32xf32>, vector<32x32xf32>, vector<16x32xf32> -> vector<16x32xf32>
    %143 = arith.addf %140, %142 : vector<16x32xf32>
    %cst_48 = arith.constant dense<0.000000e+00> : vector<16xf32>
    %144 = vector.multi_reduction <add>, %143, %cst_48 [1] : vector<16x32xf32> to vector<16xf32>
    %145 = vector.shape_cast %144 : vector<16xf32> to vector<16x1xf32>
    %cst_49 = arith.constant 3.200000e+01 : f32
    %146 = vector.broadcast %cst_49 : f32 to vector<16x1xf32>
    %147 = arith.divf %145, %146 : vector<16x1xf32>
    %148 = arith.mulf %143, %143 : vector<16x32xf32>
    %cst_50 = arith.constant dense<0.000000e+00> : vector<16xf32>
    %149 = vector.multi_reduction <add>, %148, %cst_50 [1] : vector<16x32xf32> to vector<16xf32>
    %150 = vector.shape_cast %149 : vector<16xf32> to vector<16x1xf32>
    %cst_51 = arith.constant 3.200000e+01 : f32
    %151 = vector.broadcast %cst_51 : f32 to vector<16x1xf32>
    %152 = arith.divf %150, %151 : vector<16x1xf32>
    %153 = arith.mulf %147, %147 : vector<16x1xf32>
    %154 = arith.subf %152, %153 : vector<16x1xf32>
    %155 = vector.broadcast %147 : vector<16x1xf32> to vector<16x32xf32>
    %156 = arith.subf %143, %155 : vector<16x32xf32>
    %cst_52 = arith.constant 9.99999974E-6 : f32
    %157 = vector.broadcast %cst_52 : f32 to vector<16x1xf32>
    %158 = arith.addf %154, %157 : vector<16x1xf32>
    %159 = math.rsqrt %158 : vector<16x1xf32>
    %160 = vector.broadcast %159 : vector<16x1xf32> to vector<16x32xf32>
    %161 = arith.mulf %156, %160 : vector<16x32xf32>
    %162 = vector.broadcast %4 : vector<1x32xf32> to vector<16x32xf32>
    %163 = arith.mulf %161, %162 : vector<16x32xf32>
    %164 = vector.broadcast %5 : vector<1x32xf32> to vector<16x32xf32>
    %165 = arith.addf %163, %164 : vector<16x32xf32>
    %c0_53 = arith.constant 0 : index
    %c0_54 = arith.constant 0 : index
    %166 = vector.load %arg5[%c0_53, %c0_54] : memref<16x32xf32, #tpu.memory_space<vmem>>, vector<16x32xf32>
    tpu.vector_store %arg5[%c0_53, %c0_54], %165 {strides = array<i32>} : memref<16x32xf32, #tpu.memory_space<vmem>>, vector<16x32xf32>,
    return
  }
}

</mosaic_0001>

<bundles_post_ra>
// kernel: transformer_layer_forward.1
= control target key start
LH: loop header
LB: loop body
LE: loop exit
PB: predicated region body
PF: predicated region fallthrough
CT: control target
= control target key end

     0   :  { %vm46_vm0 = vcmask 261120   ;;  %vm165_vm1 = vcmask 64512   ;;  %v131_v19 = vlaneseq  ;;  %vm251_vm7 = vcmask 130048   ;;  %s1828_s6 = smov 88   ;;  %s1829_s7 = smov 120   ;;  %s2092_s1 = inlined_call_operand.vmem [shape: f32[32,96], index: 1, kind: input, shape index: {}]   ;;  %s2093_s0 = inlined_call_operand.vmem [shape: f32[16,32], index: 0, kind: input, shape index: {}]   ;;  %s2094_s2 = inlined_call_operand.vmem [shape: f32[1,96], index: 2, kind: input, shape index: {}]   ;;  %s2095_s3 = inlined_call_operand.vmem [shape: f32[64,32], index: 3, kind: input, shape index: {}]   ;;  %s2096_s4 = inlined_call_operand.vmem [shape: f32[5,32], index: 4, kind: input, shape index: {}]   ;;  %s2097_s5 = inlined_call_operand.vmem [shape: f32[16,32], index: 5, kind: output, shape index: {}]  }
   0x1   :  { %v35_v0 = vld [vmem:[%s2092_s1] sm:$0xff]  ;;  %v36_v1 = vld [vmem:[%s2092_s1 + $0x8] sm:$0xff]  ;;  %v37_v2 = vld [vmem:[%s2092_s1 + $0x10] sm:$0xff]  ;;  %s1830_s8 = smov 48   ;;  %s1831_s9 = smov 56  }
   0x2   :  { %v1673_v3 = vpack.c.bf16 %v36_v1, %v35_v0  ;;  %v38_v4 = vld [vmem:[%s2092_s1 + $0x18] sm:$0xff]  ;;  %v1882_v5 = vld [vmem:[%s2093_s0] sm:$0xff]  ;;  %v1889_v7 = vld [vmem:[%s2093_s0 + $0x8] sm:$0xff]  ;;  %s1826_s0 = smov 96   ;;  %v1919_v20 = vand.u32 127, %v131_v19  ;;  %s1832_s10 = smov 72  }
   0x3   :  { %v1677_v6 = vpack.c.bf16 %v38_v4, %v37_v2  ;;  %1583 = vmatprep.mubr.msk.f32.mxu0 %vm46_vm0, %v1882_v5  ;;  %v1477_v8 = vld [vmem:[%s2094_s2] ss:$0 sm:$0xff]  ;;  %vm1909_vm2 = vmpackc.low %vm165_vm1, %vm165_vm1  ;;  %s1827_s2 = smov 64   ;;  %s1833_s11 = smov 80  }
   0x4   :  { %1674 = vmatprep.subr.bf16.mxu0 %v1673_v3  ;;  %vm151_vm3 = vcmp.ge.s32.totalorder %v1919_v20, 8  ;;  %vm154_vm4 = vcmp.lt.s32.totalorder %v1919_v20, 16  ;;  %vm142_vm6 = vcmp.lt.s32.totalorder %v1919_v20, 8  ;;  %s1834_s12 = smov 112   ;;  %s1835_s13 = smov 104  }
   0x5   :  { %1676 = vmatpush3.bf16.msra.mxu0 %v1673_v3  ;;  %vm1923_vm5 = vmand %vm151_vm3, %vm154_vm4  ;;  %s1836_s14 = smov 40  }
   0x6   :  { %1678 = vmatprep.subr.bf16.mxu0 %v1677_v6 }
   0x9   :  { %1680 = vmatpush3.bf16.msra.mxu0 %v1677_v6 }
   0xc   :  { %1584 = vmatmul.mubr.msk.f32.vlgmr.msra.gmra.mrb[0].mxu0 %vm46_vm0, %v1889_v7 }
  0xdf   :  { %v1585_v9 = vpop.f32.mrb[0].mxu0 }
  0xe0   :  { %v1896_v10 = vadd.f32 %v1585_v9, %v1477_v8  ;;  %v119_v11 = vpop.f32.mrb[1].mxu0 }
  0xe1   :  { %v1898_v12 = vadd.f32 %v1477_v8, %v119_v11 }
  0xe3   :  { %1590 = vmatprep.mubr.msk.f32.mxu1 %vm165_vm1, %v1898_v12  ;;  %v1904_v13 = vpack.i.bf16 %v1896_v10, %v1898_v12 }
  0xe5   :  { %1747 = vrot.lane.b32.xlu0 %v1904_v13, %s1826_s0 }
 0x157   :  { %v1748_v14 = vpop.permute.xlu0 %1747 }
 0x158   :  { %v1750_v15 = vunpack.i.h.bf16 %v1748_v14  ;;  %v1749_v16 = vunpack.i.l.bf16 %v1748_v14 }
 0x15a   :  { %v1681_v18 = vpack.c.bf16 %v1750_v15, %v1749_v16 }
 0x15c   :  { %1683 = vmatprep.subr.msk.bf16.mxu1 %vm1909_vm2, %v1681_v18 }
 0x15d   :  { %1686 = vmatpush3.bf16.xpose.msk.msra.mxu1 %vm1909_vm2, %v1681_v18 }
 0x164   :  { %1591 = vmatmul.mubr.msk.f32.vlgmr.msra.gmra.mrb[0].mxu1 %vm165_vm1, %v1896_v10 }
 0x237   :  { %v1592_v22 = vpop.f32.mrb[0].mxu1 }
 0x238   :  { %v250_v23 = vsel %vm1923_vm5, %v1592_v22, -1e+30  ;;  %v240_v24 = vpop.f32.mrb[1].mxu1 }
 0x239   :  { %v249_v25 = vsel %vm142_vm6, %v240_v24, -1e+30  ;;  %v255_v26 = vsel %vm251_vm7, %v250_v23, -inf }
 0x23a   :  { %256 = vmax.xlane.f32.xlu1 %v255_v26  ;;  %v252_v27 = vsel %vm251_vm7, %v249_v25, -inf }
 0x23b   :  { %253 = vmax.xlane.f32.xlu0 %v252_v27 }
 0x24b   :  { %1752 = vrot.lane.b32.xlu1 %v1904_v13, %s1827_s2 }
 0x24f   :  { %1757 = vrot.lane.b32.xlu1 %v1904_v13, %s1828_s6 }
 0x253   :  { %361 = vrot.lane.b32.xlu1 %v1898_v12, %s1829_s7 }
 0x257   :  { %363 = vrot.lane.b32.xlu1 %v1896_v10, %s1829_s7 }
 0x2c7   :  { %v257_v28 = vpop.xlane.xlu1 %256 }
 0x2c8   :  { %v259_v29 = vsub.f32 %v250_v23, %v257_v28  ;;  %v254_v30 = vpop.xlane.xlu0 %253 }
 0x2c9   :  { %v258_v31 = vsub.f32 %v249_v25, %v254_v30 }
 0x2ca   :  { %v262_v32 = vmul.f32 1.442695, %v259_v29 }
 0x2cb   :  { %v260_v33 = vmul.f32 1.442695, %v258_v31  ;;  %v1753_v34 = vpop.permute.xlu1 %1752 }
 0x2cc   :  { %v1755_v35 = vunpack.i.h.bf16 %v1753_v34  ;;  %v1754_v36 = vunpack.i.l.bf16 %v1753_v34 }
 0x2cd   :  { %1786 = vpow2.f32 %v260_v33 }
 0x2ce   :  { %1788 = vpow2.f32 %v262_v32  ;;  %v1687_v37 = vpack.c.bf16 %v1755_v35, %v1754_v36 }
 0x2cf   :  { %v1758_v38 = vpop.permute.xlu1 %1757 }
 0x2d0   :  { %v1760_v39 = vunpack.i.h.bf16 %v1758_v38  ;;  %v1759_v40 = vunpack.i.l.bf16 %v1758_v38  ;;  %1688 = vmatprep.subr.bf16.mxu1 %v1687_v37 }
 0x2d1   :  { %1690 = vmatpush3.bf16.msra.mxu1 %v1687_v37 }
 0x2d2   :  { %v1691_v41 = vpack.c.bf16 %v1760_v39, %v1759_v40 }
 0x2d3   :  { %v362_v44 = vpop.permute.xlu1 %361 }
 0x2d4   :  { %1693 = vmatprep.subr.msk.bf16.mxu1 %vm1909_vm2, %v1691_v41 }
 0x2d7   :  { %v1940_v42 = vpop.eup %1786  ;;  %v364_v45 = vpop.permute.xlu1 %363 }
 0x2d8   :  { %v1942_v43 = vpop.eup %1788  ;;  %1597 = vmatprep.mubr.msk.f32.mxu1 %vm251_vm7, %v1940_v42 }
 0x2d9   :  { %1598 = vmatmul.mubr.msk.f32.vlgmr.msra.gmra.mrb[2].mxu1 %vm251_vm7, %v1942_v43  ;;  %v267_v21 = vsel %vm251_vm7, %v1942_v43, 0.0 }
 0x2da   :  { %1696 = vmatpush3.bf16.xpose.msk.msra.mxu1 %vm1909_vm2, %v1691_v41  ;;  %1604 = vmatprep.mubr.msk.f32.mxu1 %vm165_vm1, %v362_v44 }
 0x2e1   :  { %1605 = vmatmul.mubr.msk.f32.vlgmr.msra.gmra.mrb[4].mxu1 %vm165_vm1, %v364_v45 }
 0x3ac   :  { %v1952_v46 = vpop.f32.mrb[2].mxu1 }
 0x3ad   :  { %v1954_v47 = vpop.f32.mrb[3].mxu1 }
 0x3b4   :  { %v1606_v48 = vpop.f32.mrb[4].mxu1 }
 0x3b5   :  { %v453_v49 = vsel %vm1923_vm5, %v1606_v48, -1e+30  ;;  %v443_v50 = vpop.f32.mrb[5].mxu1 }
 0x3b6   :  { %v452_v51 = vsel %vm142_vm6, %v443_v50, -1e+30  ;;  %v457_v52 = vsel %vm251_vm7, %v453_v49, -inf }
 0x3b7   :  { %458 = vmax.xlane.f32.xlu0 %v457_v52  ;;  %v454_v53 = vsel %vm251_vm7, %v452_v51, -inf  ;;  %v264_v52 = vsel %vm251_vm7, %v1940_v42, 0.0 }
 0x3b8   :  { %455 = vmax.xlane.f32.xlu1 %v454_v53 }
 0x3c9   :  { %1772 = vrot.lane.b32.xlu1 %v1904_v13, %s1830_s8 }
 0x3cd   :  { %1762 = vrot.lane.b32.xlu0 %v1904_v13, %s1831_s9  ;;  %1777 = vrot.lane.b32.xlu1 %v1904_v13, %s1832_s10 }
 0x3d1   :  { %1767 = vrot.lane.b32.xlu0 %v1904_v13, %s1833_s11 }
 0x3d5   :  { %563 = vrot.lane.b32.xlu0 %v1898_v12, %s1834_s12 }
 0x3d9   :  { %565 = vrot.lane.b32.xlu0 %v1896_v10, %s1834_s12 }
 0x444   :  { %v459_v54 = vpop.xlane.xlu0 %458 }
 0x445   :  { %v461_v55 = vsub.f32 %v453_v49, %v459_v54  ;;  %v456_v56 = vpop.xlane.xlu1 %455 }
 0x446   :  { %v460_v57 = vsub.f32 %v452_v51, %v456_v56 }
 0x447   :  { %v464_v58 = vmul.f32 1.442695, %v461_v55 }
 0x448   :  { %v462_v59 = vmul.f32 1.442695, %v460_v57  ;;  %v1763_v60 = vpop.permute.xlu0 %1762 }
 0x449   :  { %v1765_v61 = vunpack.i.h.bf16 %v1763_v60  ;;  %v1764_v62 = vunpack.i.l.bf16 %v1763_v60  ;;  %v1773_v63 = vpop.permute.xlu1 %1772 }
 0x44a   :  { %1790 = vpow2.f32 %v462_v59  ;;  %v1775_v0 = vunpack.i.h.bf16 %v1773_v63  ;;  %v1774_v1 = vunpack.i.l.bf16 %v1773_v63  ;;  %v28_v63 = vld [vmem:[%s2095_s3 + $0x8] sm:$0xff] }
 0x44b   :  { %1792 = vpow2.f32 %v464_v58  ;;  %v1697_v2 = vpack.c.bf16 %v1765_v61, %v1764_v62 }
 0x44c   :  { %v1707_v3 = vpack.c.bf16 %v1775_v0, %v1774_v1  ;;  %v1768_v4 = vpop.permute.xlu0 %1767 }
 0x44d   :  { %v1770_v6 = vunpack.i.h.bf16 %v1768_v4  ;;  %v1769_v8 = vunpack.i.l.bf16 %v1768_v4  ;;  %1698 = vmatprep.subr.bf16.mxu0 %v1697_v2  ;;  %v1778_v9 = vpop.permute.xlu1 %1777 }
 0x44e   :  { %v1780_v11 = vunpack.i.h.bf16 %v1778_v9  ;;  %v1779_v14 = vunpack.i.l.bf16 %v1778_v9  ;;  %1700 = vmatpush3.bf16.msra.mxu0 %v1697_v2  ;;  %1708 = vmatprep.subr.bf16.mxu1 %v1707_v3 }
 0x44f   :  { %v1701_v15 = vpack.c.bf16 %v1770_v6, %v1769_v8  ;;  %1710 = vmatpush3.bf16.msra.mxu1 %v1707_v3  ;;  %v27_v3 = vld [vmem:[%s2095_s3] sm:$0xff] }
 0x450   :  { %v1711_v16 = vpack.c.bf16 %v1780_v11, %v1779_v14  ;;  %v564_v22 = vpop.permute.xlu0 %563 }
 0x451   :  { %1703 = vmatprep.subr.msk.bf16.mxu0 %vm1909_vm2, %v1701_v15 }
 0x452   :  { %1713 = vmatprep.subr.msk.bf16.mxu1 %vm1909_vm2, %v1711_v16 }
 0x454   :  { %v1791_v18 = vpop.eup %1790  ;;  %v566_v23 = vpop.permute.xlu0 %565 }
 0x455   :  { %v1793_v19 = vpop.eup %1792  ;;  %1611 = vmatprep.mubr.msk.f32.mxu0 %vm251_vm7, %v1791_v18  ;;  %v466_v54 = vsel %vm251_vm7, %v1791_v18, 0.0 }
 0x456   :  { %1612 = vmatmul.mubr.msk.f32.vlgmr.msra.gmra.mrb[2].mxu0 %vm251_vm7, %v1793_v19  ;;  %v469_v51 = vsel %vm251_vm7, %v1793_v19, 0.0 }
 0x457   :  { %1706 = vmatpush3.bf16.xpose.msk.msra.mxu0 %vm1909_vm2, %v1701_v15  ;;  %1618 = vmatprep.mubr.msk.f32.mxu0 %vm165_vm1, %v564_v22 }
 0x45e   :  { %1619 = vmatmul.mubr.msk.f32.vlgmr.msra.gmra.mrb[4].mxu0 %vm165_vm1, %v566_v23 }
 0x529   :  { %v1978_v24 = vpop.f32.mrb[2].mxu0 }
 0x52a   :  { %v1980_v25 = vpop.f32.mrb[3].mxu0 }
 0x531   :  { %v1620_v26 = vpop.f32.mrb[4].mxu0 }
 0x532   :  { %v655_v27 = vsel %vm1923_vm5, %v1620_v26, -1e+30  ;;  %v645_v28 = vpop.f32.mrb[5].mxu0  ;;  %v29_v26 = vld [vmem:[%s2095_s3 + $0x10] sm:$0xff] }
 0x533   :  { %v654_v29 = vsel %vm142_vm6, %v645_v28, -1e+30  ;;  %v659_v30 = vsel %vm251_vm7, %v655_v27, -inf }
 0x534   :  { %660 = vmax.xlane.f32.xlu0 %v659_v30  ;;  %v656_v31 = vsel %vm251_vm7, %v654_v29, -inf }
 0x535   :  { %657 = vmax.xlane.f32.xlu1 %v656_v31 }
 0x546   :  { %765 = vrot.lane.b32.xlu1 %v1898_v12, %s1835_s13 }
 0x54a   :  { %767 = vrot.lane.b32.xlu1 %v1896_v10, %s1835_s13 }
 0x5c1   :  { %v661_v32 = vpop.xlane.xlu0 %660 }
 0x5c2   :  { %v663_v33 = vsub.f32 %v655_v27, %v661_v32  ;;  %v658_v34 = vpop.xlane.xlu1 %657 }
 0x5c3   :  { %v662_v35 = vsub.f32 %v654_v29, %v658_v34 }
 0x5c4   :  { %v666_v36 = vmul.f32 1.442695, %v663_v33 }
 0x5c5   :  { %v664_v37 = vmul.f32 1.442695, %v662_v35 }
 0x5c6   :  { %v766_v40 = vpop.permute.xlu1 %765 }
 0x5c7   :  { %1794 = vpow2.f32 %v664_v37 }
 0x5c8   :  { %1796 = vpow2.f32 %v666_v36 }
 0x5ca   :  { %v768_v10 = vpop.permute.xlu1 %767 }
 0x5d1   :  { %v1795_v38 = vpop.eup %1794 }
 0x5d2   :  { %v1797_v39 = vpop.eup %1796  ;;  %1625 = vmatprep.mubr.msk.f32.mxu1 %vm251_vm7, %v1795_v38  ;;  %v668_v20 = vsel %vm251_vm7, %v1795_v38, 0.0  ;;  %v1512_v38 = vld [vmem:[%s2096_s4] ss:$0 sm:$0xff] }
 0x5d3   :  { %1626 = vmatmul.mubr.msk.f32.vlgmr.msra.gmra.mrb[6].mxu1 %vm251_vm7, %v1797_v39  ;;  %v671_v53 = vsel %vm251_vm7, %v1797_v39, 0.0 }
 0x5d4   :  { %1716 = vmatpush3.bf16.xpose.msk.msra.mxu1 %vm1909_vm2, %v1711_v16  ;;  %1632 = vmatprep.mubr.msk.f32.mxu1 %vm165_vm1, %v766_v40 }
 0x5db   :  { %1633 = vmatmul.mubr.msk.f32.vlgmr.msra.gmra.mrb[8].mxu1 %vm165_vm1, %v768_v10 }
 0x6a6   :  { %v1996_v12 = vpop.f32.mrb[6].mxu1 }
 0x6a7   :  { %v1998_v41 = vpop.f32.mrb[7].mxu1 }
 0x6ae   :  { %v1634_v44 = vpop.f32.mrb[8].mxu1 }
 0x6af   :  { %v857_v45 = vsel %vm1923_vm5, %v1634_v44, -1e+30  ;;  %v847_v48 = vpop.f32.mrb[9].mxu1 }
 0x6b0   :  { %v856_v49 = vsel %vm142_vm6, %v847_v48, -1e+30  ;;  %v861_v17 = vsel %vm251_vm7, %v857_v45, -inf }
 0x6b1   :  { %862 = vmax.xlane.f32.xlu0 %v861_v17  ;;  %v858_v50 = vsel %vm251_vm7, %v856_v49, -inf }
 0x6b2   :  { %859 = vmax.xlane.f32.xlu1 %v858_v50 }
 0x6b6   :  { %470 = vadd.xlane.f32.xlu1 %v469_v51 }
 0x6ba   :  { %265 = vadd.xlane.f32.xlu1 %v264_v52  ;;  %v33_v52 = vld [vmem:[%s2095_s3 + $0x30] sm:$0xff] }
 0x6be   :  { %268 = vadd.xlane.f32.xlu1 %v267_v21 }
 0x6c2   :  { %669 = vadd.xlane.f32.xlu1 %v668_v20  ;;  %v34_v20 = vld [vmem:[%s2095_s3 + $0x38] sm:$0xff] }
 0x6c6   :  { %672 = vadd.xlane.f32.xlu1 %v671_v53  ;;  %v1725_v53 = vpack.c.bf16 %v34_v20, %v33_v52 }
 0x6c7   :  { %1782 = vrot.lane.b32.xlu0 %v1904_v13, %s1836_s14 }
 0x6e6   :  { %467 = vadd.xlane.f32.xlu0 %v466_v54 }
 0x73e   :  { %v863_v55 = vpop.xlane.xlu0 %862 }
 0x73f   :  { %v865_v56 = vsub.f32 %v857_v45, %v863_v55  ;;  %v860_v42 = vpop.xlane.xlu1 %859 }
 0x740   :  { %v864_v57 = vsub.f32 %v856_v49, %v860_v42 }
 0x741   :  { %v868_v58 = vmul.f32 1.442695, %v865_v56 }
 0x742   :  { %v866_v59 = vmul.f32 1.442695, %v864_v57  ;;  %v1783_v43 = vpop.permute.xlu0 %1782 }
 0x743   :  { %1798 = vpow2.f32 %v868_v58  ;;  %v1785_v60 = vunpack.i.h.bf16 %v1783_v43  ;;  %v1784_v61 = vunpack.i.l.bf16 %v1783_v43  ;;  %v471_v4 = vpop.xlane.xlu1 %470 }
 0x744   :  { %1800 = vpow2.f32 %v866_v59 }
 0x745   :  { %v1717_v62 = vpack.c.bf16 %v1785_v60, %v1784_v61  ;;  %1802 = vrcp.f32 %v471_v4  ;;  %v1513_v4 = vld [vmem:[%s2096_s4 + $0x1] ss:$0 sm:$0xff] }
 0x747   :  { %1718 = vmatprep.subr.bf16.mxu0 %v1717_v62  ;;  %v266_v6 = vpop.xlane.xlu1 %265 }
 0x748   :  { %1720 = vmatpush3.bf16.msra.mxu0 %v1717_v62  ;;  %1804 = vrcp.f32 %v266_v6 }
 0x749   :  { %1642 = vmatprep.subr.mxu0 %v28_v63 }
 0x74b   :  { %v269_v8 = vpop.xlane.xlu1 %268 }
 0x74d   :  { %v1799_v13 = vpop.eup %1798 }
 0x74e   :  { %v1801_v0 = vpop.eup %1800  ;;  %v873_v1 = vsel %vm251_vm7, %v1799_v13, 0.0 }
 0x74f   :  { %874 = vadd.xlane.f32.xlu0 %v873_v1  ;;  %1639 = vmatprep.mubr.msk.f32.mxu0 %vm251_vm7, %v1801_v0  ;;  %v870_v2 = vsel %vm251_vm7, %v1801_v0, 0.0  ;;  %v670_v11 = vpop.xlane.xlu1 %669  ;;  %v1803_v14 = vpop.eup %1802 }
 0x750   :  { %1640 = vmatmul.mubr.msk.f32.vlgmr.msra.gmra.mrb[6].mxu0 %vm251_vm7, %v1799_v13  ;;  %871 = vadd.xlane.f32.xlu1 %v870_v2  ;;  %v562_v19 = vmul.f32 %v1803_v14, %v1978_v24 }
 0x751   :  { %1643 = vmatpush3.msra.mxu0 %v28_v63 }
 0x752   :  { %1647 = vmatprep.subr.mxu0 %v27_v3  ;;  %v1805_v15 = vpop.eup %1804 }
 0x753   :  { %v673_v22 = vpop.xlane.xlu1 %672  ;;  %v359_v23 = vmul.f32 %v1805_v15, %v1954_v47  ;;  %v30_v47 = vld [vmem:[%s2095_s3 + $0x18] sm:$0xff] }
 0x773   :  { %v468_v9 = vpop.xlane.xlu0 %467 }
 0x774   :  { %1806 = vrcp.f32 %v468_v9 }
 0x775   :  { %1808 = vrcp.f32 %v269_v8 }
 0x776   :  { %1810 = vrcp.f32 %v670_v11  ;;  %v1514_v11 = vld [vmem:[%s2096_s4 + $0x2] ss:$0 sm:$0xff] }
 0x777   :  { %1812 = vrcp.f32 %v673_v22 }
 0x77e   :  { %v1807_v16 = vpop.eup %1806 }
 0x77f   :  { %v561_v18 = vmul.f32 %v1807_v16, %v1980_v25  ;;  %v1809_v27 = vpop.eup %1808 }
 0x780   :  { %v1811_v25 = vpop.eup %1810  ;;  %v360_v24 = vmul.f32 %v1809_v27, %v1952_v46 }
 0x781   :  { %1644 = vmatprep.mubr.msk.f32.mxu0 %vm165_vm1, %v561_v18  ;;  %v763_v28 = vmul.f32 %v1811_v25, %v1998_v41  ;;  %v1813_v29 = vpop.eup %1812 }
 0x782   :  { %1645 = vmatmul.mubr.msk.f32.vlgmr.msra.gmra.mrb[8].mxu0 %vm165_vm1, %v562_v19  ;;  %v764_v30 = vmul.f32 %v1813_v29, %v1996_v12 }
 0x783   :  { %1649 = vmatprep.mubr.msk.f32.mxu0 %vm165_vm1, %v359_v23  ;;  %1648 = vmatpush3.msra.mxu0 %v27_v3 }
 0x784   :  { %1652 = vmatprep.subr.mxu0 %v29_v26 }
 0x78a   :  { %1650 = vmatmul.mubr.msk.f32.vlgmr.msra.gmra.mrb[8].mxu0 %vm165_vm1, %v360_v24 }
 0x78b   :  { %1654 = vmatprep.mubr.msk.f32.mxu0 %vm165_vm1, %v763_v28  ;;  %1653 = vmatpush3.msra.mxu0 %v29_v26 }
 0x78c   :  { %1657 = vmatprep.subr.mxu0 %v30_v47 }
 0x792   :  { %1655 = vmatmul.mubr.msk.f32.vlgmr.msra.gmra.mrb[8].mxu0 %vm165_vm1, %v764_v30 }
 0x793   :  { %1658 = vmatpush3.msra.mxu0 %v30_v47 }
 0x7dc   :  { %v875_v46 = vpop.xlane.xlu0 %874 }
 0x7dd   :  { %v872_v31 = vpop.xlane.xlu1 %871 }
 0x7de   :  { %1814 = vrcp.f32 %v872_v31 }
 0x7df   :  { %1816 = vrcp.f32 %v875_v46 }
 0x7e8   :  { %v1815_v33 = vpop.eup %1814 }
 0x7e9   :  { %v1817_v35 = vpop.eup %1816 }
 0x823   :  { %v1641_v32 = vpop.f32.mrb[6].mxu0 }
 0x824   :  { %v954_v34 = vpop.f32.mrb[7].mxu0  ;;  %v966_v37 = vmul.f32 %v1817_v35, %v1641_v32 }
 0x825   :  { %v965_v36 = vmul.f32 %v1815_v33, %v954_v34 }
 0x827   :  { %1659 = vmatprep.mubr.msk.f32.mxu0 %vm165_vm1, %v965_v36 }
 0x828   :  { %1660 = vmatmul.mubr.msk.f32.vlgmr.msra.gmra.mrb[8].mxu0 %vm165_vm1, %v966_v37 }
 0x8fb   :  { %v1661_v39 = vpop.f32.mrb[8].mxu0 }
 0x8fc   :  { %v1300_v40 = vadd.f32 %v1661_v39, %v1512_v38  ;;  %v1284_v10 = vpop.f32.mrb[9].mxu0 }
 0x8fd   :  { %v1299_v12 = vadd.f32 %v1512_v38, %v1284_v10 }
 0x8fe   :  { %v1302_v41 = vadd.f32 %v1300_v40, %v1889_v7  ;;  %v31_v7 = vld [vmem:[%s2095_s3 + $0x20] sm:$0xff] }
 0x8ff   :  { %v1301_v44 = vadd.f32 %v1299_v12, %v1882_v5  ;;  %v32_v5 = vld [vmem:[%s2095_s3 + $0x28] sm:$0xff] }
 0x900   :  { %v1306_v45 = vsel %vm46_vm0, %v1302_v41, 0.0  ;;  %v1313_v48 = vmul.f32 %v1302_v41, %v1302_v41  ;;  %v1721_v21 = vpack.c.bf16 %v32_v5, %v31_v7 }
 0x901   :  { %1307 = vadd.xlane.f32.xlu0 %v1306_v45  ;;  %v1303_v49 = vsel %vm46_vm0, %v1301_v44, 0.0  ;;  %v1312_v17 = vmul.f32 %v1301_v44, %v1301_v44  ;;  %v1517_v45 = vld [vmem:[%s2096_s4 + $0x3] ss:$0 sm:$0xff] }
 0x902   :  { %1304 = vadd.xlane.f32.xlu1 %v1303_v49  ;;  %v1317_v50 = vsel %vm46_vm0, %v1313_v48, 0.0  ;;  %1722 = vmatprep.subr.bf16.mxu1 %v1721_v21 }
 0x903   :  { %v1314_v51 = vsel %vm46_vm0, %v1312_v17, 0.0  ;;  %1724 = vmatpush3.bf16.msra.mxu1 %v1721_v21 }
 0x904   :  { %1726 = vmatprep.subr.bf16.mxu1 %v1725_v53 }
 0x905   :  { %1318 = vadd.xlane.f32.xlu0 %v1317_v50  ;;  %v1518_v50 = vld [vmem:[%s2096_s4 + $0x4] ss:$0 sm:$0xff] }
 0x906   :  { %1315 = vadd.xlane.f32.xlu1 %v1314_v51 }
 0x907   :  { %1728 = vmatpush3.bf16.msra.mxu1 %v1725_v53 }
 0x98e   :  { %v1308_v54 = vpop.xlane.xlu0 %1307 }
 0x98f   :  { %v1311_v55 = vmul.f32 0.03125, %v1308_v54  ;;  %v1305_v56 = vpop.xlane.xlu1 %1304 }
 0x990   :  { %v1310_v42 = vmul.f32 0.03125, %v1305_v56 }
 0x991   :  { %v1323_v58 = vmul.f32 %v1311_v55, %v1311_v55  ;;  %v1327_v1 = vsub.f32 %v1302_v41, %v1311_v55 }
 0x992   :  { %v1319_v57 = vpop.xlane.xlu0 %1318  ;;  %v1322_v60 = vmul.f32 %v1310_v42, %v1310_v42  ;;  %v1326_v3 = vsub.f32 %v1301_v44, %v1310_v42 }
 0x993   :  { %v1321_v59 = vmul.f32 0.03125, %v1319_v57  ;;  %v1316_v43 = vpop.xlane.xlu1 %1315 }
 0x994   :  { %v1320_v61 = vmul.f32 0.03125, %v1316_v43 }
 0x995   :  { %v1325_v62 = vsub.f32 %v1321_v59, %v1323_v58 }
 0x996   :  { %v1324_v63 = vsub.f32 %v1320_v61, %v1322_v60 }
 0x997   :  { %v1329_v13 = vadd.f32 1e-05, %v1325_v62 }
 0x998   :  { %v1328_v0 = vadd.f32 1e-05, %v1324_v63 }
 0x999   :  { %1818 = vrsqrt.f32 %v1329_v13 }
 0x99a   :  { %1820 = vrsqrt.f32 %v1328_v0 }
 0x9a3   :  { %v1819_v2 = vpop.eup %1818 }
 0x9a4   :  { %v1821_v6 = vpop.eup %1820  ;;  %v1333_v8 = vmul.f32 %v1819_v2, %v1327_v1 }
 0x9a5   :  { %v1332_v9 = vmul.f32 %v1821_v6, %v1326_v3 }
 0x9a6   :  { %v1339_v14 = vmul.f32 %v1513_v4, %v1333_v8 }
 0x9a7   :  { %v1338_v15 = vmul.f32 %v1513_v4, %v1332_v9 }
 0x9a8   :  { %v1345_v18 = vadd.f32 %v1514_v11, %v1339_v14 }
 0x9a9   :  { %v1344_v16 = vadd.f32 %v1514_v11, %v1338_v15 }
 0x9ab   :  { %1670 = vmatprep.mubr.msk.f32.mxu1 %vm46_vm0, %v1344_v16 }
 0x9ac   :  { %1671 = vmatmul.mubr.msk.f32.vlgmr.msra.gmra.mrb[10].mxu1 %vm46_vm0, %v1345_v18 }
 0xa7f   :  { %v1672_v19 = vpop.f32.mrb[10].mxu1 }
 0xa80   :  { %v1428_v22 = vadd.f32 %v1672_v19, %v1345_v18  ;;  %v1418_v23 = vpop.f32.mrb[11].mxu1 }
 0xa81   :  { %v1427_v26 = vadd.f32 %v1418_v23, %v1344_v16 }
 0xa82   :  { %v1432_v27 = vsel %vm46_vm0, %v1428_v22, 0.0  ;;  %v1438_v25 = vmul.f32 %v1428_v22, %v1428_v22 }
 0xa83   :  { %1433 = vadd.xlane.f32.xlu0 %v1432_v27  ;;  %v1429_v24 = vsel %vm46_vm0, %v1427_v26, 0.0  ;;  %v1437_v28 = vmul.f32 %v1427_v26, %v1427_v26 }
 0xa84   :  { %1430 = vadd.xlane.f32.xlu1 %v1429_v24  ;;  %v1442_v47 = vsel %vm46_vm0, %v1438_v25, 0.0 }
 0xa85   :  { %v1439_v29 = vsel %vm46_vm0, %v1437_v28, 0.0 }
 0xa87   :  { %1443 = vadd.xlane.f32.xlu0 %v1442_v47 }
 0xa88   :  { %1440 = vadd.xlane.f32.xlu1 %v1439_v29 }
 0xb10   :  { %v1434_v30 = vpop.xlane.xlu0 %1433 }
 0xb11   :  { %v1436_v31 = vmul.f32 0.03125, %v1434_v30  ;;  %v1431_v46 = vpop.xlane.xlu1 %1430 }
 0xb12   :  { %v1435_v32 = vmul.f32 0.03125, %v1431_v46 }
 0xb13   :  { %v1448_v34 = vmul.f32 %v1436_v31, %v1436_v31  ;;  %v1452_v41 = vsub.f32 %v1428_v22, %v1436_v31 }
 0xb14   :  { %v1444_v33 = vpop.xlane.xlu0 %1443  ;;  %v1447_v37 = vmul.f32 %v1435_v32, %v1435_v32  ;;  %v1451_v48 = vsub.f32 %v1427_v26, %v1435_v32 }
 0xb15   :  { %v1446_v35 = vmul.f32 0.03125, %v1444_v33  ;;  %v1441_v36 = vpop.xlane.xlu1 %1440 }
 0xb16   :  { %v1445_v38 = vmul.f32 0.03125, %v1441_v36 }
 0xb17   :  { %v1450_v39 = vsub.f32 %v1446_v35, %v1448_v34 }
 0xb18   :  { %v1449_v40 = vsub.f32 %v1445_v38, %v1447_v37 }
 0xb19   :  { %v1454_v10 = vadd.f32 1e-05, %v1450_v39 }
 0xb1a   :  { %v1453_v12 = vadd.f32 1e-05, %v1449_v40 }
 0xb1b   :  { %1822 = vrsqrt.f32 %v1454_v10 }
 0xb1c   :  { %1824 = vrsqrt.f32 %v1453_v12 }
 0xb25   :  { %v1823_v44 = vpop.eup %1822 }
 0xb26   :  { %v1825_v49 = vpop.eup %1824  ;;  %v1458_v17 = vmul.f32 %v1823_v44, %v1452_v41 }
 0xb27   :  { %v1457_v51 = vmul.f32 %v1825_v49, %v1451_v48 }
 0xb28   :  { %v1464_v7 = vmul.f32 %v1517_v45, %v1458_v17 }
 0xb29   :  { %v1463_v5 = vmul.f32 %v1517_v45, %v1457_v51 }
 0xb2a   :  { %v1470_v52 = vadd.f32 %v1518_v50, %v1464_v7 }
 0xb2b   :  { %v1469_v21 = vadd.f32 %v1518_v50, %v1463_v5 }
 0xb2c   :  { %1472 = vst.msk [vmem:[%s2097_s5 + $0x8] sm:$0xff] %vm46_vm0, %v1470_v52 }
 0xb2d   :  { %1471 = vst.msk [vmem:[%s2097_s5] sm:$0xff] %vm46_vm0, %v1469_v21 }

</bundles_post_ra>
